<compile_context>
chip_gen: v7x
topology: tpu7x:2x2x1
jax: 0.10.0
libtpu: 0.0.40
codegen_flags: <defaults>
</compile_context>

<pallas_src>
import functools
import math

import jax
import jax.numpy as jnp
from jax import lax
from jax.experimental import pallas as pl
from jax.experimental.pallas import tpu as pltpu


# ---------------------------------------------------------------------------
# Fused QKV-projection + multi-head attention kernel (one batch element / step)
# ---------------------------------------------------------------------------
def _fused_self_attention_kernel(x_ref, wt_ref, b_ref, *rest,
                                 num_heads, head_dim, scale, has_mask):
    if has_mask:
        m_ref, o_ref = rest
    else:
        (o_ref,) = rest

    x = x_ref[0]                                   # (S, H), native dtype
    H = num_heads * head_dim

    # Fused QKV projection on the MXU, f32 accumulate.
    qkv = jnp.dot(x, wt_ref[...], preferred_element_type=jnp.float32)   # (S, 3H)
    qkv = qkv + b_ref[...].astype(jnp.float32)
    qkv = qkv.astype(x.dtype)                      # native-dtype MXU operands below

    q_all = qkv[:, 0:H]
    k_all = qkv[:, H:2 * H]
    v_all = qkv[:, 2 * H:3 * H]

    if has_mask:
        mask = m_ref[0, 0].astype(jnp.float32)     # (S, S); broadcasts over heads

    ctx_heads = []
    # Static (trace-time) loop over heads: all head matmuls issue back-to-back
    # inside one grid step; NH is a small compile-time constant.
    for h in range(num_heads):
        lo = h * head_dim
        hi = lo + head_dim
        qh = q_all[:, lo:hi] * scale               # scale Q (S*Dh), not scores (S^2)
        kh = k_all[:, lo:hi]
        vh = v_all[:, lo:hi]

        scores = lax.dot_general(                  # (S, S) f32, no k transpose copy
            qh, kh, dimension_numbers=(((1,), (1,)), ((), ())),
            preferred_element_type=jnp.float32)
        if has_mask:
            scores = scores + mask

        s_max = jnp.max(scores, axis=-1, keepdims=True)
        e = jnp.exp(scores - s_max)
        denom = jnp.sum(e, axis=-1, keepdims=True)
        # Exact reciprocal keeps parity with the f32 reference; switch to
        # pl.reciprocal(denom, approx=True) (EUP slot) if tolerance allows.
        probs = e * pl.reciprocal(denom, approx=False)
        # TODO(synk): training-mode dropout on probs via pltpu.prng_seed /
        #             pltpu.prng_random_bits; eval mode = identity.

        ctx_heads.append(
            jnp.dot(probs.astype(vh.dtype), vh, preferred_element_type=jnp.float32))

    # Merge heads and store once as a lane-dense (S, H) tile.
    o_ref[0] = jnp.concatenate(ctx_heads, axis=-1).astype(o_ref.dtype)
    # TODO(synk): output_attentions=True would add attention_probs as a second output.


# ---------------------------------------------------------------------------
# Wrapper
# ---------------------------------------------------------------------------
def spubert_self_attention(hidden_states, wq, bq, wk, bk, wv, bv, num_heads,
                           attention_mask=None):
    """hidden_states: (B, S, H). wq/wk/wv: (H, H) PyTorch (out, in). Returns (B, S, H)."""
    B, S, H = hidden_states.shape
    Dh = H // num_heads
    scale = 1.0 / math.sqrt(Dh)
    dt = hidden_states.dtype

    # Pack + transpose the QKV weights ONCE (amortized over all grid steps / calls).
    w_t = jnp.concatenate([wq, wk, wv], axis=0).T.astype(dt)            # (H, 3H)
    b_packed = jnp.concatenate([bq, bk, bv]).reshape(1, 3 * H).astype(dt)

    has_mask = attention_mask is not None
    kernel = functools.partial(_fused_self_attention_kernel,
                               num_heads=num_heads, head_dim=Dh,
                               scale=scale, has_mask=has_mask)

    in_specs = [
        pl.BlockSpec((1, S, H), lambda b: (b, 0, 0)),      # streamed activations
        pl.BlockSpec((H, 3 * H), lambda b: (0, 0)),        # resident packed weight
        pl.BlockSpec((1, 3 * H), lambda b: (0, 0)),        # resident packed bias
    ]
    args = [hidden_states, w_t, b_packed]
    if has_mask:
        # Accept any additive mask broadcastable to (B, 1, S, S): BERT padding
        # masks (B,1,1,S), causal masks (1,1,S,S), full (B,1,S,S), ...
        # TODO(synk): per-head masks would need a (B, NH, S, S) block instead.
        mask4 = jnp.broadcast_to(attention_mask.astype(jnp.float32), (B, 1, S, S))
        in_specs.append(pl.BlockSpec((1, 1, S, S), lambda b: (b, 0, 0, 0)))
        args.append(mask4)

    return pl.pallas_call(
        kernel,
        out_shape=jax.ShapeDtypeStruct((B, S, H), dt),
        grid=(B,),
        in_specs=in_specs,
        out_specs=pl.BlockSpec((1, S, H), lambda b: (b, 0, 0)),
        compiler_params=pltpu.CompilerParams(
            dimension_semantics=("parallel",),
            vmem_limit_bytes=48 * 1024 * 1024),
    )(*args)


# ---------------------------------------------------------------------------
# Pure-JAX reference
# ---------------------------------------------------------------------------
def _reference(hidden_states, wq, bq, wk, bk, wv, bv, num_heads, attention_mask=None):
    B, S, H = hidden_states.shape
    Dh = H // num_heads

    def proj(w, b):
        y = jnp.einsum("bsh,oh->bso", hidden_states, w) + b
        return y.reshape(B, S, num_heads, Dh).transpose(0, 2, 1, 3)

    q, k, v = proj(wq, bq), proj(wk, bk), proj(wv, bv)
    scores = jnp.einsum("bnqd,bnkd->bnqk", q, k) / math.sqrt(Dh)
    if attention_mask is not None:
        scores = scores + attention_mask
    probs = jax.nn.softmax(scores, axis=-1)
    ctx = jnp.einsum("bnqk,bnkd->bnqd", probs, v)
    return ctx.transpose(0, 2, 1, 3).reshape(B, S, H)


if __name__ == "__main__":
    # cfg: hidden_size=32, num_head=4 (head_size=8), dropout_prob (eval -> no-op)
    B, S, H, NH = 2, 8, 32, 4

    key = jax.random.PRNGKey(0)
    kx, kq, kk, kv, kbq, kbk, kbv = jax.random.split(key, 7)

    hidden_states = jax.random.normal(kx, (B, S, H), dtype=jnp.float32)
    wq = jax.random.normal(kq, (H, H), dtype=jnp.float32) * 0.02   # PyTorch (out, in)
    wk = jax.random.normal(kk, (H, H), dtype=jnp.float32) * 0.02
    wv = jax.random.normal(kv, (H, H), dtype=jnp.float32) * 0.02
    bq = jax.random.normal(kbq, (H,), dtype=jnp.float32) * 0.02
    bk = jax.random.normal(kbk, (H,), dtype=jnp.float32) * 0.02
    bv = jax.random.normal(kbv, (H,), dtype=jnp.float32) * 0.02

    # Case 1: no attention mask
    out = spubert_self_attention(hidden_states, wq, bq, wk, bk, wv, bv, NH,
                                 attention_mask=None)
    out = jax.block_until_ready(out)
    ref = _reference(hidden_states, wq, bq, wk, bk, wv, bv, NH, attention_mask=None)
    assert out.shape == (B, S, H)
    assert jnp.allclose(out, ref, atol=1e-4, rtol=1e-4), \
        f"max err (no mask): {jnp.max(jnp.abs(out - ref))}"

    # Case 2: standard BERT-style additive padding mask (B, 1, 1, S)
    pad = jnp.ones((B, S), dtype=jnp.float32).at[1, -2:].set(0.0)
    ext_mask = (1.0 - pad)[:, None, None, :] * -10000.0
    out_m = spubert_self_attention(hidden_states, wq, bq, wk, bk, wv, bv, NH,
                                   attention_mask=ext_mask)
    out_m = jax.block_until_ready(out_m)
    ref_m = _reference(hidden_states, wq, bq, wk, bk, wv, bv, NH, attention_mask=ext_mask)
    assert jnp.allclose(out_m, ref_m, atol=1e-4, rtol=1e-4), \
        f"max err (mask): {jnp.max(jnp.abs(out_m - ref_m))}"

    print("KERNEL_OK")
</pallas_src>

<mosaic_0001>
module attributes {stable_mosaic.version = 11 : i64} {
  func.func @_fused_self_attention_kernel(%arg0: i32, %arg1: memref<1x8x32xf32, #tpu.memory_space<vmem>>, %arg2: memref<32x96xf32, #tpu.memory_space<vmem>>, %arg3: memref<1x96xf32, #tpu.memory_space<vmem>>, %arg4: memref<1x8x32xf32, #tpu.memory_space<vmem>>) attributes {dimension_semantics = [#tpu.dimension_semantics<parallel>], iteration_bounds = array<i64: 2>, scalar_prefetch = 0 : i64, scratch_operands = 0 : i64, tpu.core_type = #tpu.core_type<tc>, window_params = [{transform_indices = @transform_0, window_bounds = array<i64: 1, 8, 32>}, {pipeline_mode = #tpu.pipeline_mode<synchronous>, transform_indices = @transform_1, window_bounds = array<i64: 32, 96>}, {pipeline_mode = #tpu.pipeline_mode<synchronous>, transform_indices = @transform_2, window_bounds = array<i64: 1, 96>}, {transform_indices = @transform_3, window_bounds = array<i64: 1, 8, 32>}]} {
    %c0 = arith.constant 0 : index
    %c0_0 = arith.constant 0 : index
    %c0_1 = arith.constant 0 : index
    %0 = vector.load %arg1[%c0, %c0_0, %c0_1] : memref<1x8x32xf32, #tpu.memory_space<vmem>>, vector<1x8x32xf32>
    %1 = vector.shape_cast %0 : vector<1x8x32xf32> to vector<8x32xf32>
    %c0_2 = arith.constant 0 : index
    %c0_3 = arith.constant 0 : index
    %2 = vector.load %arg2[%c0_2, %c0_3] : memref<32x96xf32, #tpu.memory_space<vmem>>, vector<32x96xf32>
    %cst = arith.constant dense<0.000000e+00> : vector<8x96xf32>
    %3 = tpu.matmul %1, %2, %cst {dimension_numbers = #tpu.dot_dimension_numbers<[1], [0], [0], [1], [0, 0, 1, 1], [], []>} : vector<8x32xf32>, vector<32x96xf32>, vector<8x96xf32> -> vector<8x96xf32>
    %c0_4 = arith.constant 0 : index
    %c0_5 = arith.constant 0 : index
    %4 = vector.load %arg3[%c0_4, %c0_5] : memref<1x96xf32, #tpu.memory_space<vmem>>, vector<1x96xf32>
    %5 = vector.broadcast %4 : vector<1x96xf32> to vector<8x96xf32>
    %6 = arith.addf %3, %5 : vector<8x96xf32>
    %7 = vector.extract_strided_slice %6 {offsets = [0, 0], sizes = [8, 32], strides = [1, 1]} : vector<8x96xf32> to vector<8x32xf32>
    %8 = vector.extract_strided_slice %6 {offsets = [0, 32], sizes = [8, 32], strides = [1, 1]} : vector<8x96xf32> to vector<8x32xf32>
    %9 = vector.extract_strided_slice %6 {offsets = [0, 64], sizes = [8, 32], strides = [1, 1]} : vector<8x96xf32> to vector<8x32xf32>
    %10 = vector.extract_strided_slice %7 {offsets = [0, 0], sizes = [8, 8], strides = [1, 1]} : vector<8x32xf32> to vector<8x8xf32>
    %cst_6 = arith.constant 0.353553385 : f32
    %11 = vector.broadcast %cst_6 : f32 to vector<8x8xf32>
    %12 = arith.mulf %10, %11 : vector<8x8xf32>
    %13 = vector.extract_strided_slice %8 {offsets = [0, 0], sizes = [8, 8], strides = [1, 1]} : vector<8x32xf32> to vector<8x8xf32>
    %14 = vector.extract_strided_slice %9 {offsets = [0, 0], sizes = [8, 8], strides = [1, 1]} : vector<8x32xf32> to vector<8x8xf32>
    %cst_7 = arith.constant dense<0.000000e+00> : vector<8x8xf32>
    %15 = tpu.matmul %12, %13, %cst_7 {dimension_numbers = #tpu.dot_dimension_numbers<[1], [1], [0], [0], [0, 0, 1, 0], [], []>} : vector<8x8xf32>, vector<8x8xf32>, vector<8x8xf32> -> vector<8x8xf32>
    %cst_8 = arith.constant dense<0xFF800000> : vector<8xf32>
    %16 = vector.multi_reduction <maximumf>, %15, %cst_8 [1] : vector<8x8xf32> to vector<8xf32>
    %17 = vector.shape_cast %16 : vector<8xf32> to vector<8x1xf32>
    %18 = vector.broadcast %17 : vector<8x1xf32> to vector<8x8xf32>
    %19 = arith.subf %15, %18 : vector<8x8xf32>
    %20 = math.exp %19 : vector<8x8xf32>
    %cst_9 = arith.constant dense<0.000000e+00> : vector<8xf32>
    %21 = vector.multi_reduction <add>, %20, %cst_9 [1] : vector<8x8xf32> to vector<8xf32>
    %22 = vector.shape_cast %21 : vector<8xf32> to vector<8x1xf32>
    %23 = tpu.reciprocal %22 : vector<8x1xf32> -> vector<8x1xf32>
    %24 = vector.broadcast %23 : vector<8x1xf32> to vector<8x8xf32>
    %25 = arith.mulf %20, %24 : vector<8x8xf32>
    %cst_10 = arith.constant dense<0.000000e+00> : vector<8x8xf32>
    %26 = tpu.matmul %25, %14, %cst_10 {dimension_numbers = #tpu.dot_dimension_numbers<[1], [0], [0], [1], [0, 0, 1, 1], [], []>} : vector<8x8xf32>, vector<8x8xf32>, vector<8x8xf32> -> vector<8x8xf32>
    %27 = vector.extract_strided_slice %7 {offsets = [0, 8], sizes = [8, 8], strides = [1, 1]} : vector<8x32xf32> to vector<8x8xf32>
    %cst_11 = arith.constant 0.353553385 : f32
    %28 = vector.broadcast %cst_11 : f32 to vector<8x8xf32>
    %29 = arith.mulf %27, %28 : vector<8x8xf32>
    %30 = vector.extract_strided_slice %8 {offsets = [0, 8], sizes = [8, 8], strides = [1, 1]} : vector<8x32xf32> to vector<8x8xf32>
    %31 = vector.extract_strided_slice %9 {offsets = [0, 8], sizes = [8, 8], strides = [1, 1]} : vector<8x32xf32> to vector<8x8xf32>
    %cst_12 = arith.constant dense<0.000000e+00> : vector<8x8xf32>
    %32 = tpu.matmul %29, %30, %cst_12 {dimension_numbers = #tpu.dot_dimension_numbers<[1], [1], [0], [0], [0, 0, 1, 0], [], []>} : vector<8x8xf32>, vector<8x8xf32>, vector<8x8xf32> -> vector<8x8xf32>
    %cst_13 = arith.constant dense<0xFF800000> : vector<8xf32>
    %33 = vector.multi_reduction <maximumf>, %32, %cst_13 [1] : vector<8x8xf32> to vector<8xf32>
    %34 = vector.shape_cast %33 : vector<8xf32> to vector<8x1xf32>
    %35 = vector.broadcast %34 : vector<8x1xf32> to vector<8x8xf32>
    %36 = arith.subf %32, %35 : vector<8x8xf32>
    %37 = math.exp %36 : vector<8x8xf32>
    %cst_14 = arith.constant dense<0.000000e+00> : vector<8xf32>
    %38 = vector.multi_reduction <add>, %37, %cst_14 [1] : vector<8x8xf32> to vector<8xf32>
    %39 = vector.shape_cast %38 : vector<8xf32> to vector<8x1xf32>
    %40 = tpu.reciprocal %39 : vector<8x1xf32> -> vector<8x1xf32>
    %41 = vector.broadcast %40 : vector<8x1xf32> to vector<8x8xf32>
    %42 = arith.mulf %37, %41 : vector<8x8xf32>
    %cst_15 = arith.constant dense<0.000000e+00> : vector<8x8xf32>
    %43 = tpu.matmul %42, %31, %cst_15 {dimension_numbers = #tpu.dot_dimension_numbers<[1], [0], [0], [1], [0, 0, 1, 1], [], []>} : vector<8x8xf32>, vector<8x8xf32>, vector<8x8xf32> -> vector<8x8xf32>
    %44 = vector.extract_strided_slice %7 {offsets = [0, 16], sizes = [8, 8], strides = [1, 1]} : vector<8x32xf32> to vector<8x8xf32>
    %cst_16 = arith.constant 0.353553385 : f32
    %45 = vector.broadcast %cst_16 : f32 to vector<8x8xf32>
    %46 = arith.mulf %44, %45 : vector<8x8xf32>
    %47 = vector.extract_strided_slice %8 {offsets = [0, 16], sizes = [8, 8], strides = [1, 1]} : vector<8x32xf32> to vector<8x8xf32>
    %48 = vector.extract_strided_slice %9 {offsets = [0, 16], sizes = [8, 8], strides = [1, 1]} : vector<8x32xf32> to vector<8x8xf32>
    %cst_17 = arith.constant dense<0.000000e+00> : vector<8x8xf32>
    %49 = tpu.matmul %46, %47, %cst_17 {dimension_numbers = #tpu.dot_dimension_numbers<[1], [1], [0], [0], [0, 0, 1, 0], [], []>} : vector<8x8xf32>, vector<8x8xf32>, vector<8x8xf32> -> vector<8x8xf32>
    %cst_18 = arith.constant dense<0xFF800000> : vector<8xf32>
    %50 = vector.multi_reduction <maximumf>, %49, %cst_18 [1] : vector<8x8xf32> to vector<8xf32>
    %51 = vector.shape_cast %50 : vector<8xf32> to vector<8x1xf32>
    %52 = vector.broadcast %51 : vector<8x1xf32> to vector<8x8xf32>
    %53 = arith.subf %49, %52 : vector<8x8xf32>
    %54 = math.exp %53 : vector<8x8xf32>
    %cst_19 = arith.constant dense<0.000000e+00> : vector<8xf32>
    %55 = vector.multi_reduction <add>, %54, %cst_19 [1] : vector<8x8xf32> to vector<8xf32>
    %56 = vector.shape_cast %55 : vector<8xf32> to vector<8x1xf32>
    %57 = tpu.reciprocal %56 : vector<8x1xf32> -> vector<8x1xf32>
    %58 = vector.broadcast %57 : vector<8x1xf32> to vector<8x8xf32>
    %59 = arith.mulf %54, %58 : vector<8x8xf32>
    %cst_20 = arith.constant dense<0.000000e+00> : vector<8x8xf32>
    %60 = tpu.matmul %59, %48, %cst_20 {dimension_numbers = #tpu.dot_dimension_numbers<[1], [0], [0], [1], [0, 0, 1, 1], [], []>} : vector<8x8xf32>, vector<8x8xf32>, vector<8x8xf32> -> vector<8x8xf32>
    %61 = vector.extract_strided_slice %7 {offsets = [0, 24], sizes = [8, 8], strides = [1, 1]} : vector<8x32xf32> to vector<8x8xf32>
    %cst_21 = arith.constant 0.353553385 : f32
    %62 = vector.broadcast %cst_21 : f32 to vector<8x8xf32>
    %63 = arith.mulf %61, %62 : vector<8x8xf32>
    %64 = vector.extract_strided_slice %8 {offsets = [0, 24], sizes = [8, 8], strides = [1, 1]} : vector<8x32xf32> to vector<8x8xf32>
    %65 = vector.extract_strided_slice %9 {offsets = [0, 24], sizes = [8, 8], strides = [1, 1]} : vector<8x32xf32> to vector<8x8xf32>
    %cst_22 = arith.constant dense<0.000000e+00> : vector<8x8xf32>
    %66 = tpu.matmul %63, %64, %cst_22 {dimension_numbers = #tpu.dot_dimension_numbers<[1], [1], [0], [0], [0, 0, 1, 0], [], []>} : vector<8x8xf32>, vector<8x8xf32>, vector<8x8xf32> -> vector<8x8xf32>
    %cst_23 = arith.constant dense<0xFF800000> : vector<8xf32>
    %67 = vector.multi_reduction <maximumf>, %66, %cst_23 [1] : vector<8x8xf32> to vector<8xf32>
    %68 = vector.shape_cast %67 : vector<8xf32> to vector<8x1xf32>
    %69 = vector.broadcast %68 : vector<8x1xf32> to vector<8x8xf32>
    %70 = arith.subf %66, %69 : vector<8x8xf32>
    %71 = math.exp %70 : vector<8x8xf32>
    %cst_24 = arith.constant dense<0.000000e+00> : vector<8xf32>
    %72 = vector.multi_reduction <add>, %71, %cst_24 [1] : vector<8x8xf32> to vector<8xf32>
    %73 = vector.shape_cast %72 : vector<8xf32> to vector<8x1xf32>
    %74 = tpu.reciprocal %73 : vector<8x1xf32> -> vector<8x1xf32>
    %75 = vector.broadcast %74 : vector<8x1xf32> to vector<8x8xf32>
    %76 = arith.mulf %71, %75 : vector<8x8xf32>
    %cst_25 = arith.constant dense<0.000000e+00> : vector<8x8xf32>
    %77 = tpu.matmul %76, %65, %cst_25 {dimension_numbers = #tpu.dot_dimension_numbers<[1], [0], [0], [1], [0, 0, 1, 1], [], []>} : vector<8x8xf32>, vector<8x8xf32>, vector<8x8xf32> -> vector<8x8xf32>
    %78 = tpu.concatenate %26, %43, %60, %77 in 1 : vector<8x8xf32>, vector<8x8xf32>, vector<8x8xf32>, vector<8x8xf32> -> vector<8x32xf32>
    %c0_26 = arith.constant 0 : index
    %c0_27 = arith.constant 0 : index
    %c0_28 = arith.constant 0 : index
    %79 = vector.load %arg4[%c0_26, %c0_27, %c0_28] : memref<1x8x32xf32, #tpu.memory_space<vmem>>, vector<1x8x32xf32>
    %80 = vector.shape_cast %79 : vector<1x8x32xf32> to vector<8x32xf32>
    %81 = vector.shape_cast %78 : vector<8x32xf32> to vector<1x8x32xf32>
    tpu.vector_store %arg4[%c0_26, %c0_27, %c0_28], %81 {strides = array<i32>} : memref<1x8x32xf32, #tpu.memory_space<vmem>>, vector<1x8x32xf32>,
    return
  }
  func.func @transform_0(%arg0: i32) -> (i32, i32, i32) {
    %c0_i32 = arith.constant 0 : i32
    %c0_i32_0 = arith.constant 0 : i32
    %c0_i32_1 = arith.constant 0 : i32
    return %arg0, %c0_i32, %c0_i32_0 : i32, i32, i32
  }
  func.func @transform_1(%arg0: i32) -> (i32, i32) {
    %c0_i32 = arith.constant 0 : i32
    %c0_i32_0 = arith.constant 0 : i32
    %c0_i32_1 = arith.constant 0 : i32
    return %c0_i32, %c0_i32_0 : i32, i32
  }
  func.func @transform_2(%arg0: i32) -> (i32, i32) {
    %c0_i32 = arith.constant 0 : i32
    %c0_i32_0 = arith.constant 0 : i32
    %c0_i32_1 = arith.constant 0 : i32
    return %c0_i32, %c0_i32_0 : i32, i32
  }
  func.func @transform_3(%arg0: i32) -> (i32, i32, i32) {
    %c0_i32 = arith.constant 0 : i32
    %c0_i32_0 = arith.constant 0 : i32
    %c0_i32_1 = arith.constant 0 : i32
    return %arg0, %c0_i32, %c0_i32_0 : i32, i32, i32
  }
}

</mosaic_0001>

<bundles_post_ra>
// kernel: tpu_custom_call.1
= control target key start
LH: loop header
LB: loop body
LE: loop exit
PB: predicated region body
PF: predicated region fallthrough
CT: control target
= control target key end

     0   :  { %8 = vsyncpa [#allocation3], 0  ;;  %s1694_s0 = inlined_call_operand.hbm [shape: f32[2,8,32], index: 0, kind: input, shape index: {}]   ;;  %s1695_s1 = inlined_call_operand.hbm [shape: f32[32,96], index: 1, kind: input, shape index: {}]   ;;  %s1696_s2 = inlined_call_operand.vmem [shape: f32[1,96], index: 2, kind: input, shape index: {}]   ;;  %s1697_s3 = inlined_call_operand.hbm [shape: f32[2,8,32], index: 3, kind: output, shape index: {}]  }
   0x1   :  { %10 = vsyncpa [#allocation3 + $0x1], 0 }
   0x2   :  { %11 = vsyncpa [#allocation6], 0 }
   0x3   :  { %12 = vsyncpa [#allocation4], 0 }
   0x4   :  { %14 = vsyncpa [#allocation4 + $0x1], 0  ;;  %s1431_s12 = smov 0   ;;  %s1433_s13 = smov 0  }
   0x5   :  { %s1435_s14 = smov 0   ;;  %s1437_s15 = smov 0  }
   0x6 LB: > { %s1452_s16 = sadd.s32 4294967295, %s1387_s15   ;;  %s1061_s17 = sadd.s32 4294967294, %s1387_s15   ;;  %s1387_s15 = sphi %s1437_s15, %s1717_s15   ;;  %s1383_s14 = sphi %s1435_s14, %s1716_s14   ;;  %s1379_s13 = sphi %s1433_s13, %s1715_s13   ;;  %s1375_s12 = sphi %s1431_s12, %s1714_s12  }
   0x7   : > { %p40_p0 = scmp.ne.s32.totalorder %s1379_s13, %s1375_s12  ;;  %p1698_p1 = scmp.eq.s32.totalorder %s1452_s16, 0 }
   0x8   : > { %p112_p3 = scmp.eq.s32.totalorder %s1061_s17, 1  ;;  %p1062_p5 = scmp.ge.s32.totalorder %s1387_s15, 1 }
   0x9   : > { %p1461_p4 = por %p1698_p1, %p40_p0  ;;  %p119_p7 = scmp.lt.s32.totalorder %s1387_s15, 3 }
   0xa   : > { %p1466_p6 = por %p112_p3, %p40_p0  ;;  %s1389_s21 = smov [#allocation5]  }
   0xb   : > { %s1701_s18 = scalar_select %p1461_p4, 1, 0 }
   0xc   : > { %s1702_s19 = scalar_select %p1466_p6, 1, 0 }
   0xd   : > { %p1471_p8 = pnand %p1062_p5, %p119_p7  ;;  %s131_s22 = sshll.u32 %s1389_s21, 4  ;;  %s1475_s22 = int_to_ptr.vmem [resolvable:$true] %s131_s22 }
   0xe   : > { %s1487_s24 = sadd.s32 1, %s1387_s15   ;;  %s27_s25 = sadd.s32 1, %s1383_s14 }
   0xf   : > { %s1703_s20 = scalar_select %p1471_p8, 1, 0 }
  0x10   : > { %p1175_p9 = pneg %p1471_p8  ;;  %s24_s26 = ssub.s32 %s1387_s15, %s1487_s24 }
  0x11   : > { %s1259_s29 = scalar_lea.hbm %s1695_s1, 512 }
  0x12   : > { %p1482_p11 = pnand %p1175_p9, %p1698_p1  ;;  %p1260_p12 = scmp.ne.s32.totalorder %s1695_s1, %s1259_s29 }
  0x13   : > { %p1266_p5 = scmp.lt.u32.totalorder %s1259_s29, %s1695_s1 }
  0x14   : > { %p1261_p13 = pneg %p1482_p11 }
  0x16   : > { %p1262_p0 = pnand %p1261_p13, %p1260_p12 }
  0x18   : > { %p1263_p3 = pneg %p1262_p0 }
  0x1a   : > { %p1268_p7 = pnand %p1266_p5, %p1263_p3 }
  0x1c   : > { %1271 = shalt.err (!%p1268_p7)
}
  0x1d   : > { %s1272_s7 = scalar_lea.vmem %s1475_s22, 512  ;;  %p1280_p2 = scmp.lt.s32.totalorder %s1475_s22, %s1475_s22 }
  0x1e   : > { %p1273_p9 = scmp.ne.s32.totalorder %s1475_s22, %s1272_s7  ;;  %p1281_p6 = scmp.lt.s32.totalorder %s1272_s7, %s1272_s7 }
  0x20   : > { %p1275_p10 = pnand %p1273_p9, %p1261_p13  ;;  %p1282_p4 = por %p1281_p6, %p1280_p2 }
  0x22   : > { %p1276_p1 = pneg %p1275_p10 }
  0x24   : > { %p1283_p8 = pnand %p1282_p4, %p1276_p1 }
  0x26   : > { %1286 = shalt.err (!%p1283_p8)
}
  0x27   : > { %s1390_s8 = smov 128   ;;  %s1391_s9 = smov 8  }
  0x28   : > { %1178 = dma.hbm_to_vmem [thread:$0]  (!%p1482_p11), %s1695_s1, 512, %s1475_s22, [#allocation6], %s1390_s8, %s1390_s8, %s1391_s9  }
  0x29   : > { %p25_p2 = scmp.eq.s32.totalorder %s24_s26, 0  ;;  %p34_p1 = scmp.ne.s32.totalorder %s1383_s14, %s1379_s13 }
  0x2a   : > { %p35_p4 = scmp.eq.s32.totalorder %s1387_s15, 0  ;;  %p1188_p6 = scmp.lt.s32.totalorder %s1387_s15, 2 }
  0x2b   : > { %s1518_s17 = scalar_select %p25_p2, %s1383_s14, %s27_s25  }
  0x2c   : > { %p36_p8 = por %p35_p4, %p34_p1  ;;  %p1705_p10 = scmp.eq.s32.totalorder %s1452_s16, 1 }
  0x2d   : > { %s148_s27 = sand.u32 1, %s1383_s14   ;;  %s1066_s28 = sshll.u32 %s1387_s15, 7 }
  0x2e   : > { %p1522_p12 = por %p1705_p10, %p34_p1  ;;  %s1065_s29 = sshll.u32 %s148_s27, 3 }
  0x2f   : > { %s1531_s4 = scalar_lea.hbm %s1694_s0, %s1066_s28  ;;  %s152_s22 = scalar_lea.vmem [#allocation2], %s1065_s29 }
  0x30   : > { %s159_s25 = sshll.u32 %s152_s22, 4  ;;  %p1533_p11 = pnand %p1188_p6, %p36_p8  ;;  %s1537_s25 = int_to_ptr.vmem [resolvable:$true] %s159_s25 }
  0x31   : > { %s149_s5 = scalar_lea.sflag [#allocation3], %s148_s27  ;;  %s1287_s6 = scalar_lea.hbm %s1531_s4, 128 }
  0x32   : > { %p1288_p13 = scmp.ne.s32.totalorder %s1531_s4, %s1287_s6  ;;  %p1289_p0 = pneg %p1533_p11 }
  0x33   : > { %s1292_s9 = scalar_lea.hbm %s1694_s0, 256  ;;  %p1293_p7 = scmp.lt.u32.totalorder %s1531_s4, %s1694_s0 }
  0x34   : > { %p1290_p3 = pnand %p1289_p0, %p1288_p13  ;;  %p1294_p9 = scmp.lt.u32.totalorder %s1292_s9, %s1287_s6 }
  0x35   : > { %p1296_p1 = scmp.lt.u32.totalorder %s1287_s6, %s1531_s4 }
  0x36   : > { %p1291_p5 = pneg %p1290_p3  ;;  %p1295_p2 = por %p1294_p9, %p1293_p7 }
  0x38   : > { %p1297_p4 = por %p1296_p1, %p1295_p2 }
  0x3a   : > { %p1298_p6 = pnand %p1297_p4, %p1291_p5 }
  0x3c   : > { %1301 = shalt.err (!%p1298_p6)
}
  0x3d   : > { %s1302_s27 = scalar_lea.vmem %s1537_s25, 128  ;;  %s1392_s28 = smov [#allocation2]  }
  0x3e   : > { %p1303_p8 = scmp.ne.s32.totalorder %s1537_s25, %s1302_s27  ;;  %s1307_s29 = sshll.u32 %s1392_s28, 4  ;;  %s1308_s29 = int_to_ptr.vmem [resolvable:$false] %s1307_s29 }
  0x3f   : > { %s1309_s23 = scalar_lea.vmem %s1308_s29, 256  ;;  %p1310_p3 = scmp.lt.s32.totalorder %s1537_s25, %s1308_s29 }
  0x40   : > { %p1305_p10 = pnand %p1303_p8, %p1289_p0  ;;  %p1311_p7 = scmp.lt.s32.totalorder %s1309_s23, %s1302_s27 }
  0x42   : > { %p1306_p13 = pneg %p1305_p10  ;;  %p1312_p9 = por %p1311_p7, %p1310_p3 }
  0x44   : > { %p1313_p2 = pnand %p1312_p9, %p1306_p13 }
  0x46   : > { %1316 = shalt.err (!%p1313_p2)
}
  0x47   : > { %1182 = dma.hbm_to_vmem [thread:$0]  (!%p1533_p11), %s1531_s4, 128, %s1537_s25, %s149_s5  }
  0x48   : > { %p1708_p5 = scmp.ne.s32.totalorder %s1703_s20, 0 }
  0x49   : > { %s1567_s30 = sand.u32 (!%p1708_p5), 1, %s1379_s13   ;;  %p1709_p0 = scmp.ne.s32.totalorder (!%p1708_p5), %s1701_s18, 0 }
  0x4a   : > { %168 = sbr.rel (%p1708_p5) target bundleno = 1352 (0x548), region = 32  ;;  %s1068_s22 = sshll.u32 (!%p1708_p5), %s1567_s30, 3 }
  0x4b   : > { %s171_s6 = scalar_lea.sflag (!%p1708_p5), [#allocation3], %s1567_s30  ;;  %s174_s7 = scalar_lea.vmem (!%p1708_p5), [#allocation2], %s1068_s22 }
  0x51   : > { %1362 = dma.done.wait (%p1709_p0), %s171_s6, 128  }
  0x52   : > { %1364 = vsyncadd (%p1709_p0), %s171_s6, 4294967168  ;;  %p1710_p11 = scmp.eq.s32.totalorder %s1452_s16, 0 }
  0x54   : > { %1366 = dma.done.wait (%p1710_p11), [#allocation6], 512   ;;  %p1711_p1 = pmov %p1710_p11 }
  0x55   : > { %v1393_v0 = vmov 0.0|0.0   ;;  %vm1394_vm0 = vmmov 0   ;;  %v1395_v1 = vmov 0.0   ;;  %v202_v2 = vld [vmem:[#allocation5] sm:$0xff]  ;;  %v203_v3 = vld [vmem:[#allocation5 + $0x8] sm:$0xff]  ;;  %v204_v4 = vld [vmem:[#allocation5 + $0x10] sm:$0xff] }
  0x56   : > { %1368 = vsyncadd (%p1711_p1), [#allocation6], 4294966784  ;;  %1161 = vmatprep.subr.bf16.mxu0 %v1393_v0  ;;  %1118 = vmatprep.mubr.msk.f32.mxu0 %vm1394_vm0, %v1395_v1  ;;  %v1162_v5 = vpack.c.bf16 %v203_v3, %v202_v2  ;;  %v205_v6 = vld [vmem:[#allocation5 + $0x18] sm:$0xff]  ;;  %vm213_vm1 = vcmask 261120   ;;  %v1071_v9 = vld [vmem:[%s1696_s2] ss:$0 sm:$0xff] }
  0x57   : > { %1121 = vmatprep.subr.mxu1 %v1395_v1  ;;  %1123 = vmatprep.mubr.msk.f32.mxu1 %vm1394_vm0, %v1395_v1  ;;  %v1165_v7 = vpack.c.bf16 %v205_v6, %v204_v4  ;;  %v201_v8 = vld [vmem:[%s174_s7] sm:$0xff]  ;;  %s1396_s4 = smov 96   ;;  %s1397_s25 = smov 120   ;;  %vm291_vm2 = vcmask 64512   ;;  %vm962_vm3 = vcmask 130048   ;;  %vm964_vm4 = vcmask 195584  }
  0x58   : > { %1163 = vmatpush3.bf16.msra.mxu0 %v1162_v5  ;;  %s1398_s26 = smov 88   ;;  %s1399_s5 = smov 80  }
  0x59   : > { %1164 = vmatprep.subr.bf16.mxu0 %v1393_v0  ;;  %s1400_s8 = smov 112   ;;  %s1401_s9 = smov 72  }
  0x5a   : > { %s1402_s10 = smov 104   ;;  %s1403_s11 = smov 56  }
  0x5b   : > { %s1404_s27 = smov 64   ;;  %s1405_s28 = smov 48  }
  0x5c   : > { %1166 = vmatpush3.bf16.msra.mxu0 %v1165_v7  ;;  %s1406_s29 = smov 40   ;;  %s1407_s23 = smov 8  }
  0x5d   : > { %1131 = vmatprep.subr.mxu0 %v1395_v1  ;;  %s1408_s6 = smov 16   ;;  %s1409_s7 = smov 24  }
  0x5e   : > { %s1086_s18 = sshll.u32 %s1452_s16, 7  ;;  %s200_s20 = scalar_lea.vmem [#allocation7], %s1068_s22 }
  0x5f   : > { %1119 = vmatmul.mubr.msk.f32.vlgmr.msra.gmra.mrb[0].mxu0 %vm213_vm1, %v201_v8  ;;  %s968_s16 = scalar_lea.sflag [#allocation4], %s1567_s30 }
  0x60   : > { %1133 = vmatprep.mubr.msk.f32.mxu0 %vm1394_vm0, %v1395_v1 }
 0x132   : > { %v283_v10 = vpop.f32.mrb[0].mxu0 }
 0x133   : > { %v1593_v11 = vadd.f32 %v1071_v9, %v283_v10  ;;  %v1120_v12 = vpop.f32.mrb[1].mxu0 }
 0x135   : > { %289 = vrot.lane.b32.xlu0 %v1593_v11, %s1396_s4  ;;  %v287_v13 = vmul.f32 0.35355338, %v1593_v11  ;;  %s981_s4 = sshll.u32 %s200_s20, 4  ;;  %s1651_s4 = int_to_ptr.vmem [resolvable:$true] %s981_s4 }
 0x136   : > { %s1317_s22 = scalar_lea.vmem %s1651_s4, 128 }
 0x137   : > { %454 = vrot.lane.b32.xlu1 %v287_v13, %s1397_s25  ;;  %p1318_p4 = scmp.ne.s32.totalorder %s1651_s4, %s1317_s22 }
 0x139   : > { %456 = vrot.lane.b32.xlu0 %v1593_v11, %s1398_s26  ;;  %p1319_p6 = pnand %p1318_p4, %p1522_p12 }
 0x13b   : > { %621 = vrot.lane.b32.xlu1 %v1593_v11, %s1399_s5  ;;  %s1649_s5 = scalar_lea.hbm %s1697_s3, %s1086_s18  ;;  %p1320_p8 = pneg %p1319_p6 }
 0x13d   : > { %619 = vrot.lane.b32.xlu0 %v287_v13, %s1400_s8  ;;  %s1410_s8 = smov [#allocation7]  }
 0x13f   : > { %786 = vrot.lane.b32.xlu1 %v1593_v11, %s1401_s9  ;;  %s1321_s9 = sshll.u32 %s1410_s8, 4  ;;  %s1322_s9 = int_to_ptr.vmem [resolvable:$false] %s1321_s9 }
 0x140   : > { %p1324_p10 = scmp.lt.s32.totalorder %s1651_s4, %s1322_s9 }
 0x141   : > { %784 = vrot.lane.b32.xlu0 %v287_v13, %s1402_s10  ;;  %s1323_s10 = scalar_lea.vmem %s1322_s9, 256 }
 0x142   : > { %p1325_p13 = scmp.lt.s32.totalorder %s1323_s10, %s1317_s22 }
 0x144   : > { %p1326_p3 = por %p1325_p13, %p1324_p10 }
 0x146   : > { %p1327_p7 = pnand %p1326_p3, %p1320_p8 }
 0x1a7   : > { %v290_v14 = vpop.permute.xlu0 %289 }
 0x1a8   : > { %1122 = vmatpush3.xpose.msk.msra.mxu1 %vm291_vm2, %v290_v14 }
 0x1a9   : > { %v455_v15 = vpop.permute.xlu1 %454  ;;  %1126 = vmatprep.subr.mxu1 %v1395_v1 }
 0x1ab   : > { %v457_v16 = vpop.permute.xlu0 %456  ;;  %1124 = vmatmul.mubr.msk.f32.vlgmr.msra.gmra.mrb[0].mxu1 %vm291_vm2, %v287_v13 }
 0x1ac   : > { %1132 = vmatpush3.xpose.msk.msra.mxu0 %vm291_vm2, %v457_v16  ;;  %1128 = vmatprep.mubr.msk.f32.mxu1 %vm1394_vm0, %v1395_v1 }
 0x1ad   : > { %v622_v17 = vpop.permute.xlu1 %621  ;;  %1141 = vmatprep.subr.mxu0 %v1395_v1 }
 0x1af   : > { %1134 = vmatmul.mubr.msk.f32.vlgmr.msra.gmra.mrb[2].mxu0 %vm291_vm2, %v455_v15  ;;  %v620_v18 = vpop.permute.xlu0 %619 }
 0x1b0   : > { %1142 = vmatpush3.xpose.msk.msra.mxu0 %vm291_vm2, %v622_v17  ;;  %1143 = vmatprep.mubr.msk.f32.mxu0 %vm1394_vm0, %v1395_v1 }
 0x1b1   : > { %1151 = vmatprep.subr.mxu0 %v1395_v1  ;;  %v787_v19 = vpop.permute.xlu1 %786 }
 0x1b3   : > { %1144 = vmatmul.mubr.msk.f32.vlgmr.msra.gmra.mrb[4].mxu0 %vm291_vm2, %v620_v18  ;;  %v785_v20 = vpop.permute.xlu0 %784 }
 0x1b4   : > { %1152 = vmatpush3.xpose.msk.msra.mxu0 %vm291_vm2, %v787_v19  ;;  %1153 = vmatprep.mubr.msk.f32.mxu0 %vm1394_vm0, %v1395_v1 }
 0x1b7   : > { %1154 = vmatmul.mubr.msk.f32.vlgmr.msra.gmra.mrb[6].mxu0 %vm291_vm2, %v785_v20 }
 0x27e   : > { %v363_v21 = vpop.f32.mrb[0].mxu1 }
 0x27f   : > { %v1125_v22 = vpop.f32.mrb[1].mxu1  ;;  %v367_v23 = vsel %vm291_vm2, %v363_v21, -inf }
 0x280   : > { %368 = vmax.xlane.f32.xlu1 %v367_v23 }
 0x282   : > { %v528_v24 = vpop.f32.mrb[2].mxu0 }
 0x283   : > { %v1135_v25 = vpop.f32.mrb[3].mxu0  ;;  %v532_v26 = vsel %vm291_vm2, %v528_v24, -inf }
 0x284   : > { %533 = vmax.xlane.f32.xlu0 %v532_v26 }
 0x286   : > { %v693_v27 = vpop.f32.mrb[4].mxu0 }
 0x287   : > { %v1145_v28 = vpop.f32.mrb[5].mxu0  ;;  %v697_v29 = vsel %vm291_vm2, %v693_v27, -inf }
 0x288   : > { %698 = vmax.xlane.f32.xlu0 %v697_v29 }
 0x28a   : > { %v858_v30 = vpop.f32.mrb[6].mxu0 }
 0x28b   : > { %v1155_v31 = vpop.f32.mrb[7].mxu0  ;;  %v862_v32 = vsel %vm291_vm2, %v858_v30, -inf }
 0x28c   : > { %863 = vmax.xlane.f32.xlu1 %v862_v32 }
 0x29d   : > { %543 = vrot.lane.b32.xlu1 %v1593_v11, %s1403_s11 }
 0x30d   : > { %v369_v33 = vpop.xlane.xlu1 %368 }
 0x30e   : > { %v370_v34 = vsub.f32 %v363_v21, %v369_v33 }
 0x310   : > { %v371_v35 = vmul.f32 1.442695, %v370_v34 }
 0x311   : > { %v534_v36 = vpop.xlane.xlu0 %533 }
 0x312   : > { %1243 = vpow2.f32 %v371_v35  ;;  %v535_v37 = vsub.f32 %v528_v24, %v534_v36 }
 0x314   : > { %v536_v38 = vmul.f32 1.442695, %v535_v37 }
 0x315   : > { %v699_v48 = vpop.xlane.xlu0 %698 }
 0x316   : > { %1245 = vpow2.f32 %v536_v38  ;;  %v700_v49 = vsub.f32 %v693_v27, %v699_v48 }
 0x318   : > { %v701_v50 = vmul.f32 1.442695, %v700_v49 }
 0x319   : > { %v864_v39 = vpop.xlane.xlu1 %863 }
 0x31a   : > { %v865_v40 = vsub.f32 %v858_v30, %v864_v39 }
 0x31c   : > { %v1244_v41 = vpop.eup %1243  ;;  %v866_v42 = vmul.f32 1.442695, %v865_v40 }
 0x31d   : > { %v373_v43 = vsel %vm291_vm2, %v1244_v41, 0.0  ;;  %v544_v53 = vpop.permute.xlu1 %543 }
 0x31e   : > { %1247 = vpow2.f32 %v866_v42  ;;  %374 = vadd.xlane.f32.xlu0 %v373_v43 }
 0x31f   : > { %1249 = vpow2.f32 %v701_v50 }
 0x320   : > { %v1246_v44 = vpop.eup %1245 }
 0x321   : > { %v538_v45 = vsel %vm291_vm2, %v1246_v44, 0.0 }
 0x322   : > { %539 = vadd.xlane.f32.xlu1 %v538_v45 }
 0x328   : > { %v1248_v46 = vpop.eup %1247 }
 0x329   : > { %v868_v47 = vsel %vm291_vm2, %v1248_v46, 0.0  ;;  %v1250_v51 = vpop.eup %1249 }
 0x32a   : > { %869 = vadd.xlane.f32.xlu1 %v868_v47  ;;  %v703_v52 = vsel %vm291_vm2, %v1250_v51, 0.0 }
 0x334   : > { %378 = vrot.lane.b32.xlu0 %v1593_v11, %s1404_s27 }
 0x33b   : > { %708 = vrot.lane.b32.xlu1 %v1593_v11, %s1405_s28 }
 0x353   : > { %704 = vadd.xlane.f32.xlu0 %v703_v52 }
 0x369   : > { %873 = vrot.lane.b32.xlu0 %v1593_v11, %s1406_s29 }
 0x3ab   : > { %v375_v54 = vpop.xlane.xlu0 %374 }
 0x3ac   : > { %1251 = vrcp.f32 %v375_v54 }
 0x3af   : > { %v379_v55 = vpop.permute.xlu0 %378  ;;  %v540_v56 = vpop.xlane.xlu1 %539 }
 0x3b0   : > { %1253 = vrcp.f32 %v540_v56  ;;  %1127 = vmatpush3.msra.mxu1 %v379_v55 }
 0x3b1   : > { %1136 = vmatprep.subr.mxu1 %v1395_v1 }
 0x3b6   : > { %v1252_v57 = vpop.eup %1251 }
 0x3b7   : > { %v377_v58 = vmul.f32 %v1252_v57, %v1244_v41  ;;  %v870_v59 = vpop.xlane.xlu1 %869 }
 0x3b9   : > { %1129 = vmatmul.mubr.msk.f32.vlgmr.msra.gmra.mrb[2].mxu1 %vm291_vm2, %v377_v58 }
 0x3ba   : > { %v1254_v60 = vpop.eup %1253  ;;  %1137 = vmatpush3.msra.mxu1 %v544_v53  ;;  %1138 = vmatprep.mubr.msk.f32.mxu1 %vm1394_vm0, %v1395_v1 }
 0x3bb   : > { %v542_v61 = vmul.f32 %v1254_v60, %v1246_v44  ;;  %v709_v62 = vpop.permute.xlu1 %708  ;;  %1146 = vmatprep.subr.mxu1 %v1395_v1 }
 0x3bd   : > { %1139 = vmatmul.mubr.msk.f32.vlgmr.msra.gmra.mrb[4].mxu1 %vm291_vm2, %v542_v61 }
 0x3be   : > { %1147 = vmatpush3.msra.mxu1 %v709_v62  ;;  %1148 = vmatprep.mubr.msk.f32.mxu1 %vm1394_vm0, %v1395_v1 }
 0x3bf   : > { %1156 = vmatprep.subr.mxu1 %v1395_v1 }
 0x3e0   : > { %v705_v63 = vpop.xlane.xlu0 %704 }
 0x3e1   : > { %1255 = vrcp.f32 %v705_v63 }
 0x3e2   : > { %1257 = vrcp.f32 %v870_v59 }
 0x3e4   : > { %v874_v4 = vpop.permute.xlu0 %873 }
 0x3eb   : > { %v1256_v0 = vpop.eup %1255 }
 0x3ec   : > { %v707_v2 = vmul.f32 %v1256_v0, %v1250_v51  ;;  %v1258_v3 = vpop.eup %1257 }
 0x3ed   : > { %v872_v5 = vmul.f32 %v1258_v3, %v1248_v46 }
 0x3ee   : > { %1149 = vmatmul.mubr.msk.f32.vlgmr.msra.gmra.mrb[6].mxu1 %vm291_vm2, %v707_v2 }
 0x3ef   : > { %1157 = vmatpush3.msra.mxu1 %v874_v4  ;;  %1158 = vmatprep.mubr.msk.f32.mxu1 %vm1394_vm0, %v1395_v1 }
 0x3f2   : > { %1159 = vmatmul.mubr.msk.f32.vlgmr.msra.gmra.mrb[8].mxu1 %vm291_vm2, %v872_v5 }
 0x48c   : > { %v450_v6 = vpop.f32.mrb[2].mxu1 }
 0x48d   : > { %v1130_v7 = vpop.f32.mrb[3].mxu1 }
 0x490   : > { %v615_v8 = vpop.f32.mrb[4].mxu1 }
 0x491   : > { %950 = vrot.lane.b32.xlu1 %v615_v8, %s1407_s23  ;;  %v1140_v9 = vpop.f32.mrb[5].mxu1 }
 0x4c1   : > { %v780_v10 = vpop.f32.mrb[6].mxu1 }
 0x4c2   : > { %954 = vrot.lane.b32.xlu0 %v780_v10, %s1408_s6  ;;  %v1150_v11 = vpop.f32.mrb[7].mxu1 }
 0x4c5   : > { %v945_v12 = vpop.f32.mrb[8].mxu1 }
 0x4c6   : > { %958 = vrot.lane.b32.xlu1 %v945_v12, %s1409_s7  ;;  %v1160_v1 = vpop.f32.mrb[9].mxu1 }
 0x503   : > { %v951_v13 = vpop.permute.xlu1 %950 }
 0x504   : > { %v961_v15 = vsel %vm291_vm2, %v450_v6, %v951_v13 }
 0x534   : > { %v955_v14 = vpop.permute.xlu0 %954 }
 0x535   : > { %v963_v16 = vsel %vm962_vm3, %v961_v15, %v955_v14 }
 0x538   : > { %v959_v17 = vpop.permute.xlu1 %958 }
 0x539   : > { %v965_v18 = vsel %vm964_vm4, %v963_v16, %v959_v17 }
 0x53a   : > { %966 = vst.msk [vmem:[%s200_s20] sm:$0xff] %vm213_vm1, %v965_v18 }
 0x53b   : > { %1330 = shalt.err (!%p1327_p7)
}
 0x53c   : > { %s1331_s30 = scalar_lea.hbm %s1649_s5, 128  ;;  %s1335_s28 = scalar_lea.hbm %s1697_s3, 256 }
 0x53d   : > { %p1332_p9 = scmp.ne.s32.totalorder %s1649_s5, %s1331_s30  ;;  %p1336_p0 = scmp.lt.u32.totalorder %s1649_s5, %s1697_s3 }
 0x53e   : > { %p1337_p11 = scmp.lt.u32.totalorder %s1335_s28, %s1331_s30  ;;  %p1339_p4 = scmp.lt.u32.totalorder %s1331_s30, %s1649_s5 }
 0x53f   : > { %p1333_p2 = pnand %p1332_p9, %p1522_p12 }
 0x540   : > { %p1338_p1 = por %p1337_p11, %p1336_p0 }
 0x541   : > { %p1334_p5 = pneg %p1333_p2 }
 0x542   : > { %p1340_p6 = por %p1339_p4, %p1338_p1 }
 0x544   : > { %p1341_p8 = pnand %p1340_p6, %p1334_p5 }
 0x546   : > { %1344 = shalt.err (!%p1341_p8)
}
 0x547   : > { %1173 = dma.vmem_to_hbm [thread:$0]  (%p1522_p12), %s1651_s4, 128, %s1649_s5, %s968_s16  }
 0x548 PF: > { %s993_s6 = sand.u32 1, %s1375_s12   ;;  %p1712_p10 = scmp.ne.s32.totalorder %s1702_s19, 0 }
 0x549   : > { %p1713_p13 = scmp.ge.s32.totalorder %s1387_s15, 2  ;;  %s994_s7 = scalar_lea.sflag [#allocation4], %s993_s6 }
 0x54b   : > { %p1184_p3 = pnand %p1713_p13, %p1712_p10 }
 0x54d   : > { %1370 = dma.done.wait (!%p1184_p3), %s994_s7, 128  }
 0x54e   : > { %1372 = vsyncadd (!%p1184_p3), %s994_s7, 4294967168  ;;  %p17_p7 = scmp.ge.s32.totalorder %s1487_s24, 4   ;;  %s1714_s12 = smov %s1379_s13 }
 0x54f   : > { %s1715_s13 = smov %s1383_s14  ;;  %s1716_s14 = smov %s1518_s17 }
 0x550   : > { %s1717_s15 = smov %s1487_s24  ;;  %19 = sbr.rel (!%p17_p7) target bundleno = 6 (0x6), region = 81 }
 0x557   :  { %999 = vsyncpa [#allocation3], 1 }
 0x558   :  { %1001 = vsyncpa [#allocation3 + $0x1], 1 }
 0x559   :  { %1002 = vsyncpa [#allocation6], 1 }
 0x55a   :  { %1003 = vsyncpa [#allocation4], 1 }
 0x55b   :  { %1005 = vsyncpa [#allocation4 + $0x1], 1 }

</bundles_post_ra>
